<compile_context>
chip_gen: v7x
topology: tpu7x:2x2x1
jax: 0.10.0
libtpu: 0.0.40
codegen_flags: <defaults>
</compile_context>

<pallas_src>
import math

import jax
import jax.numpy as jnp
from jax import lax
from jax.experimental import pallas as pl
from jax.experimental.pallas import tpu as pltpu


# ---------------------------------------------------------------------------
# Fused attention kernel (one batch element per grid step)
# ---------------------------------------------------------------------------
def _attention_body(q, ctx, w_mix, w_q, out_ref, attn_ref):
    # scores: (Lq, Lc) -- contract over D on the MXU, Lc lands on the lane axis.
    scores = lax.dot_general(q, ctx, (((1,), (1,)), ((), ())),
                             preferred_element_type=jnp.float32)
    # numerically-stable softmax along the last (lane) axis
    scores = scores - jnp.max(scores, axis=-1, keepdims=True)
    e = jnp.exp(scores)
    attn = e / jnp.sum(e, axis=-1, keepdims=True)                 # (Lq, Lc)
    # mix: (Lq, D) -- attention-weighted sum of context, again on the MXU.
    mix = jnp.dot(attn, ctx, preferred_element_type=jnp.float32)
    # linear_out on cat([mix, q]) without materializing the concat:
    # split W_out^T into its mix-half and query-half and accumulate.
    out = (jnp.dot(mix, w_mix, preferred_element_type=jnp.float32)
           + jnp.dot(q, w_q, preferred_element_type=jnp.float32))
    out_ref[0] = jnp.tanh(out)
    attn_ref[0] = attn


def _attention_kernel_general(q_ref, ctx_ref, w_in_ref, w_mix_ref, w_q_ref,
                              out_ref, attn_ref):
    q = q_ref[0]                                                   # (Lq, D)
    ctx = ctx_ref[0]                                               # (Lc, D)
    # linear_in (general attention): q @ W_in^T (w_in_ref holds W_in^T).
    q = jnp.dot(q, w_in_ref[...], preferred_element_type=jnp.float32)
    _attention_body(q, ctx, w_mix_ref[...], w_q_ref[...], out_ref, attn_ref)


def _attention_kernel_dot(q_ref, ctx_ref, w_mix_ref, w_q_ref, out_ref, attn_ref):
    _attention_body(q_ref[0], ctx_ref[0], w_mix_ref[...], w_q_ref[...],
                    out_ref, attn_ref)


# ---------------------------------------------------------------------------
# Wrapper: one fused pallas_call over grid=(batch,)
# ---------------------------------------------------------------------------
def attention_forward(query, context, w_in, w_out, attention_type="general"):
    """query:(B,Lq,D)  context:(B,Lc,D)  w_in:(D,D) or None  w_out:(D,2D)."""
    if attention_type not in ("dot", "general"):
        raise ValueError("Invalid attention type selected.")

    B, Lq, D = query.shape
    Lc = context.shape[1]

    # PyTorch nn.Linear stores weight as (out, in); pre-transpose ONCE on the host
    # so every in-kernel matmul is a plain (rows, K) @ (K, cols).
    w_out_t = jnp.asarray(w_out, jnp.float32).T                    # (2D, D)
    w_mix = w_out_t[:D, :]                                         # multiplies mix
    w_q = w_out_t[D:, :]                                           # multiplies query

    weight_spec = pl.BlockSpec((D, D), lambda b: (0, 0))           # VMEM-resident

    in_specs = [
        pl.BlockSpec((1, Lq, D), lambda b: (b, 0, 0)),             # query
        pl.BlockSpec((1, Lc, D), lambda b: (b, 0, 0)),             # context
    ]
    operands = [query.astype(jnp.float32), context.astype(jnp.float32)]

    if attention_type == "general":
        kernel = _attention_kernel_general
        in_specs.append(weight_spec)
        operands.append(jnp.asarray(w_in, jnp.float32).T)          # W_in^T (D, D)
    else:
        kernel = _attention_kernel_dot

    in_specs += [weight_spec, weight_spec]
    operands += [w_mix, w_q]

    flops = B * (2 * Lq * D * D                 # linear_in
                 + 2 * Lq * Lc * D              # scores
                 + 2 * Lq * Lc * D              # mix
                 + 2 * Lq * (2 * D) * D)        # linear_out
    transcendentals = B * (Lq * Lc + Lq * D)    # exp + tanh
    bytes_accessed = 4 * (B * Lq * D + B * Lc * D + 3 * D * D
                          + B * Lq * D + B * Lq * Lc)

    grid_spec = pltpu.PrefetchScalarGridSpec(
        num_scalar_prefetch=0,
        grid=(B,),
        in_specs=in_specs,
        out_specs=(
            pl.BlockSpec((1, Lq, D), lambda b: (b, 0, 0)),         # output
            pl.BlockSpec((1, Lq, Lc), lambda b: (b, 0, 0)),        # attention weights
        ),
    )

    out, attn = pl.pallas_call(
        kernel,
        out_shape=(jax.ShapeDtypeStruct((B, Lq, D), jnp.float32),
                   jax.ShapeDtypeStruct((B, Lq, Lc), jnp.float32)),
        grid_spec=grid_spec,
        compiler_params=pltpu.CompilerParams(
            dimension_semantics=("parallel",)),
        cost_estimate=pl.CostEstimate(flops=flops,
                                      transcendentals=transcendentals,
                                      bytes_accessed=bytes_accessed),
    )(*operands)
    return out, attn


# ---------------------------------------------------------------------------
# Pure-JAX reference (mirrors the PyTorch module exactly)
# ---------------------------------------------------------------------------
def attention_reference(query, context, w_in, w_out, attention_type="general"):
    q = query
    if attention_type == "general":
        q = q @ w_in.T
    scores = jnp.einsum("bqd,bkd->bqk", q, context)
    weights = jax.nn.softmax(scores, axis=-1)
    mix = jnp.einsum("bqk,bkd->bqd", weights, context)
    combined = jnp.concatenate([mix, q], axis=-1)
    out = jnp.tanh(combined @ w_out.T)
    return out, weights


# ---------------------------------------------------------------------------
# Demo
# ---------------------------------------------------------------------------
if __name__ == "__main__":
    B, Lq, Lc, D = 2, 8, 16, 32   # batch, output length, context length, dimensions

    key = jax.random.PRNGKey(0)
    kq, kc, k1, k2 = jax.random.split(key, 4)
    query = jax.random.normal(kq, (B, Lq, D), jnp.float32)
    context = jax.random.normal(kc, (B, Lc, D), jnp.float32)
    # PyTorch Linear layouts: linear_in.weight (D, D), linear_out.weight (D, 2D)
    w_in = jax.random.normal(k1, (D, D), jnp.float32) / math.sqrt(D)
    w_out = jax.random.normal(k2, (D, 2 * D), jnp.float32) / math.sqrt(2 * D)

    out, attn = attention_forward(query, context, w_in, w_out,
                                  attention_type="general")
    out = jax.block_until_ready(out)
    attn = jax.block_until_ready(attn)

    assert out.shape == (B, Lq, D)
    assert attn.shape == (B, Lq, Lc)
    assert bool(jnp.all(jnp.isfinite(out)))
    assert bool(jnp.all(jnp.isfinite(attn)))

    ref_out, ref_attn = attention_reference(query, context, w_in, w_out,
                                            attention_type="general")
    assert bool(jnp.allclose(out, ref_out, rtol=1e-4, atol=1e-4))
    assert bool(jnp.allclose(attn, ref_attn, rtol=1e-4, atol=1e-4))
    # attention weights should sum to 1 over the context axis
    assert bool(jnp.allclose(jnp.sum(attn, axis=-1), 1.0, atol=1e-5))

    print("KERNEL_OK")
</pallas_src>

<mosaic_0001>
module attributes {stable_mosaic.version = 11 : i64} {
  func.func @_attention_kernel_general(%arg0: i32, %arg1: memref<1x8x32xf32, #tpu.memory_space<vmem>>, %arg2: memref<1x16x32xf32, #tpu.memory_space<vmem>>, %arg3: memref<32x32xf32, #tpu.memory_space<vmem>>, %arg4: memref<32x32xf32, #tpu.memory_space<vmem>>, %arg5: memref<32x32xf32, #tpu.memory_space<vmem>>, %arg6: memref<1x8x32xf32, #tpu.memory_space<vmem>>, %arg7: memref<1x8x16xf32, #tpu.memory_space<vmem>>) attributes {dimension_semantics = [#tpu.dimension_semantics<parallel>], iteration_bounds = array<i64: 2>, scalar_prefetch = 0 : i64, scratch_operands = 0 : i64, tpu.core_type = #tpu.core_type<tc>, window_params = [{transform_indices = @transform_0, window_bounds = array<i64: 1, 8, 32>}, {transform_indices = @transform_1, window_bounds = array<i64: 1, 16, 32>}, {pipeline_mode = #tpu.pipeline_mode<synchronous>, transform_indices = @transform_2, window_bounds = array<i64: 32, 32>}, {pipeline_mode = #tpu.pipeline_mode<synchronous>, transform_indices = @transform_3, window_bounds = array<i64: 32, 32>}, {pipeline_mode = #tpu.pipeline_mode<synchronous>, transform_indices = @transform_4, window_bounds = array<i64: 32, 32>}, {transform_indices = @transform_5, window_bounds = array<i64: 1, 8, 32>}, {transform_indices = @transform_6, window_bounds = array<i64: 1, 8, 16>}]} {
    %c0 = arith.constant 0 : index
    %c0_0 = arith.constant 0 : index
    %c0_1 = arith.constant 0 : index
    %0 = vector.load %arg1[%c0, %c0_0, %c0_1] : memref<1x8x32xf32, #tpu.memory_space<vmem>>, vector<1x8x32xf32>
    %1 = vector.shape_cast %0 : vector<1x8x32xf32> to vector<8x32xf32>
    %c0_2 = arith.constant 0 : index
    %c0_3 = arith.constant 0 : index
    %c0_4 = arith.constant 0 : index
    %2 = vector.load %arg2[%c0_2, %c0_3, %c0_4] : memref<1x16x32xf32, #tpu.memory_space<vmem>>, vector<1x16x32xf32>
    %3 = vector.shape_cast %2 : vector<1x16x32xf32> to vector<16x32xf32>
    %c0_5 = arith.constant 0 : index
    %c0_6 = arith.constant 0 : index
    %4 = vector.load %arg3[%c0_5, %c0_6] : memref<32x32xf32, #tpu.memory_space<vmem>>, vector<32x32xf32>
    %cst = arith.constant dense<0.000000e+00> : vector<8x32xf32>
    %5 = tpu.matmul %1, %4, %cst {dimension_numbers = #tpu.dot_dimension_numbers<[1], [0], [0], [1], [0, 0, 1, 1], [], []>} : vector<8x32xf32>, vector<32x32xf32>, vector<8x32xf32> -> vector<8x32xf32>
    %c0_7 = arith.constant 0 : index
    %c0_8 = arith.constant 0 : index
    %6 = vector.load %arg4[%c0_7, %c0_8] : memref<32x32xf32, #tpu.memory_space<vmem>>, vector<32x32xf32>
    %c0_9 = arith.constant 0 : index
    %c0_10 = arith.constant 0 : index
    %7 = vector.load %arg5[%c0_9, %c0_10] : memref<32x32xf32, #tpu.memory_space<vmem>>, vector<32x32xf32>
    %cst_11 = arith.constant dense<0.000000e+00> : vector<8x16xf32>
    %8 = tpu.matmul %5, %3, %cst_11 {dimension_numbers = #tpu.dot_dimension_numbers<[1], [1], [0], [0], [0, 0, 1, 0], [], []>} : vector<8x32xf32>, vector<16x32xf32>, vector<8x16xf32> -> vector<8x16xf32>
    %cst_12 = arith.constant dense<0xFF800000> : vector<8xf32>
    %9 = vector.multi_reduction <maximumf>, %8, %cst_12 [1] : vector<8x16xf32> to vector<8xf32>
    %10 = vector.shape_cast %9 : vector<8xf32> to vector<8x1xf32>
    %11 = vector.broadcast %10 : vector<8x1xf32> to vector<8x16xf32>
    %12 = arith.subf %8, %11 : vector<8x16xf32>
    %13 = math.exp %12 : vector<8x16xf32>
    %cst_13 = arith.constant dense<0.000000e+00> : vector<8xf32>
    %14 = vector.multi_reduction <add>, %13, %cst_13 [1] : vector<8x16xf32> to vector<8xf32>
    %15 = vector.shape_cast %14 : vector<8xf32> to vector<8x1xf32>
    %16 = vector.broadcast %15 : vector<8x1xf32> to vector<8x16xf32>
    %17 = arith.divf %13, %16 : vector<8x16xf32>
    %cst_14 = arith.constant dense<0.000000e+00> : vector<8x32xf32>
    %18 = tpu.matmul %17, %3, %cst_14 {dimension_numbers = #tpu.dot_dimension_numbers<[1], [0], [0], [1], [0, 0, 1, 1], [], []>} : vector<8x16xf32>, vector<16x32xf32>, vector<8x32xf32> -> vector<8x32xf32>
    %cst_15 = arith.constant dense<0.000000e+00> : vector<8x32xf32>
    %19 = tpu.matmul %18, %6, %cst_15 {dimension_numbers = #tpu.dot_dimension_numbers<[1], [0], [0], [1], [0, 0, 1, 1], [], []>} : vector<8x32xf32>, vector<32x32xf32>, vector<8x32xf32> -> vector<8x32xf32>
    %cst_16 = arith.constant dense<0.000000e+00> : vector<8x32xf32>
    %20 = tpu.matmul %5, %7, %cst_16 {dimension_numbers = #tpu.dot_dimension_numbers<[1], [0], [0], [1], [0, 0, 1, 1], [], []>} : vector<8x32xf32>, vector<32x32xf32>, vector<8x32xf32> -> vector<8x32xf32>
    %21 = arith.addf %19, %20 : vector<8x32xf32>
    %22 = math.tanh %21 : vector<8x32xf32>
    %c0_17 = arith.constant 0 : index
    %c0_18 = arith.constant 0 : index
    %c0_19 = arith.constant 0 : index
    %23 = vector.load %arg6[%c0_17, %c0_18, %c0_19] : memref<1x8x32xf32, #tpu.memory_space<vmem>>, vector<1x8x32xf32>
    %24 = vector.shape_cast %23 : vector<1x8x32xf32> to vector<8x32xf32>
    %25 = vector.shape_cast %22 : vector<8x32xf32> to vector<1x8x32xf32>
    tpu.vector_store %arg6[%c0_17, %c0_18, %c0_19], %25 {strides = array<i32>} : memref<1x8x32xf32, #tpu.memory_space<vmem>>, vector<1x8x32xf32>,
    %c0_20 = arith.constant 0 : index
    %c0_21 = arith.constant 0 : index
    %c0_22 = arith.constant 0 : index
    %26 = vector.load %arg7[%c0_20, %c0_21, %c0_22] : memref<1x8x16xf32, #tpu.memory_space<vmem>>, vector<1x8x16xf32>
    %27 = vector.shape_cast %26 : vector<1x8x16xf32> to vector<8x16xf32>
    %28 = vector.shape_cast %17 : vector<8x16xf32> to vector<1x8x16xf32>
    tpu.vector_store %arg7[%c0_20, %c0_21, %c0_22], %28 {strides = array<i32>} : memref<1x8x16xf32, #tpu.memory_space<vmem>>, vector<1x8x16xf32>,
    return
  }
  func.func @transform_0(%arg0: i32) -> (i32, i32, i32) {
    %c0_i32 = arith.constant 0 : i32
    %c0_i32_0 = arith.constant 0 : i32
    %c0_i32_1 = arith.constant 0 : i32
    return %arg0, %c0_i32, %c0_i32_0 : i32, i32, i32
  }
  func.func @transform_1(%arg0: i32) -> (i32, i32, i32) {
    %c0_i32 = arith.constant 0 : i32
    %c0_i32_0 = arith.constant 0 : i32
    %c0_i32_1 = arith.constant 0 : i32
    return %arg0, %c0_i32, %c0_i32_0 : i32, i32, i32
  }
  func.func @transform_2(%arg0: i32) -> (i32, i32) {
    %c0_i32 = arith.constant 0 : i32
    %c0_i32_0 = arith.constant 0 : i32
    %c0_i32_1 = arith.constant 0 : i32
    return %c0_i32, %c0_i32_0 : i32, i32
  }
  func.func @transform_3(%arg0: i32) -> (i32, i32) {
    %c0_i32 = arith.constant 0 : i32
    %c0_i32_0 = arith.constant 0 : i32
    %c0_i32_1 = arith.constant 0 : i32
    return %c0_i32, %c0_i32_0 : i32, i32
  }
  func.func @transform_4(%arg0: i32) -> (i32, i32) {
    %c0_i32 = arith.constant 0 : i32
    %c0_i32_0 = arith.constant 0 : i32
    %c0_i32_1 = arith.constant 0 : i32
    return %c0_i32, %c0_i32_0 : i32, i32
  }
  func.func @transform_5(%arg0: i32) -> (i32, i32, i32) {
    %c0_i32 = arith.constant 0 : i32
    %c0_i32_0 = arith.constant 0 : i32
    %c0_i32_1 = arith.constant 0 : i32
    return %arg0, %c0_i32, %c0_i32_0 : i32, i32, i32
  }
  func.func @transform_6(%arg0: i32) -> (i32, i32, i32) {
    %c0_i32 = arith.constant 0 : i32
    %c0_i32_0 = arith.constant 0 : i32
    %c0_i32_1 = arith.constant 0 : i32
    return %arg0, %c0_i32, %c0_i32_0 : i32, i32, i32
  }
}

</mosaic_0001>

<bundles_post_ra>
// kernel: tpu_custom_call.1
= control target key start
LH: loop header
LB: loop body
LE: loop exit
PB: predicated region body
PF: predicated region fallthrough
CT: control target
= control target key end

     0   :  { %s1850_s0 = inlined_call_operand.hbm [shape: f32[2,8,32], index: 0, kind: input, shape index: {}]   ;;  %s1851_s1 = inlined_call_operand.hbm [shape: f32[2,16,32], index: 1, kind: input, shape index: {}]   ;;  %s1852_s2 = inlined_call_operand.hbm [shape: f32[32,32], index: 2, kind: input, shape index: {}]   ;;  %s1853_s3 = inlined_call_operand.hbm [shape: f32[32,32], index: 3, kind: input, shape index: {}]   ;;  %s1854_s4 = inlined_call_operand.hbm [shape: f32[32,32], index: 4, kind: input, shape index: {}]   ;;  %s1855_s5 = inlined_call_operand.hbm [shape: f32[2,8,32], index: 5, kind: output, shape index: {0}]   ;;  %s1856_s6 = inlined_call_operand.hbm [shape: f32[2,8,16], index: 6, kind: output, shape index: {1}]  }
   0x1   :  { %1862 = sst [smem:[#allocation20_spill]] %s1850_s0 }
   0x2   :  { %1863 = sst [smem:[#allocation21_spill]] %s1852_s2 }
   0x3   :  { %12 = vsyncpa [#allocation3], 0 }
   0x4   :  { %14 = vsyncpa [#allocation3 + $0x1], 0 }
   0x5   :  { %15 = vsyncpa [#allocation6], 0 }
   0x6   :  { %17 = vsyncpa [#allocation6 + $0x1], 0 }
   0x7   :  { %18 = vsyncpa [#allocation9], 0 }
   0x8   :  { %19 = vsyncpa [#allocation4], 0 }
   0x9   :  { %21 = vsyncpa [#allocation4 + $0x1], 0 }
   0xa   :  { %22 = vsyncpa [#allocation13], 0 }
   0xb   :  { %24 = vsyncpa [#allocation13 + $0x1], 0  ;;  %s1474_s21 = smov 0   ;;  %s1476_s22 = smov 0  }
   0xc   :  { %s1478_s23 = smov 0   ;;  %s1480_s24 = smov 0  }
   0xd LB: > { %s1495_s25 = sadd.s32 4294967295, %s1425_s24   ;;  %s945_s26 = sadd.s32 4294967294, %s1425_s24   ;;  %s1425_s24 = sphi %s1480_s24, %s1887_s24   ;;  %s1421_s23 = sphi %s1478_s23, %s1886_s23   ;;  %s1417_s22 = sphi %s1476_s22, %s1885_s22   ;;  %s1413_s21 = sphi %s1474_s21, %s1884_s21  }
   0xe   : > { %p50_p0 = scmp.ne.s32.totalorder %s1417_s22, %s1413_s21  ;;  %p1857_p1 = scmp.eq.s32.totalorder %s1495_s25, 0 }
   0xf   : > { %p169_p3 = scmp.eq.s32.totalorder %s945_s26, 1  ;;  %p946_p5 = scmp.ge.s32.totalorder %s1425_s24, 1 }
  0x10   : > { %p1504_p4 = por %p1857_p1, %p50_p0  ;;  %p202_p7 = scmp.lt.s32.totalorder %s1425_s24, 3 }
  0x11   : > { %p1509_p6 = por %p169_p3, %p50_p0  ;;  %s1427_s30 = smov [#allocation7]  }
  0x12   : > { %s1864_s27 = scalar_select %p1504_p4, 1, 0 }
  0x13   : > { %s1865_s28 = scalar_select %p1509_p6, 1, 0 }
  0x14   : > { %p1514_p8 = pnand %p946_p5, %p202_p7  ;;  %s214_s7 = sshll.u32 %s1427_s30, 4  ;;  %s1518_s7 = int_to_ptr.vmem [resolvable:$true] %s214_s7 }
  0x15   : > { %s1428_s9 = smov [#allocation8]   ;;  %s1429_s11 = smov [#allocation10]  }
  0x16   : > { %s1866_s29 = scalar_select %p1514_p8, 1, 0 }
  0x17   : > { %p1093_p9 = pneg %p1514_p8  ;;  %s227_s10 = sshll.u32 %s1428_s9, 4  ;;  %s1529_s10 = int_to_ptr.vmem [resolvable:$true] %s227_s10 }
  0x18   : > { %s1531_s12 = sshll.u32 %s1429_s11, 4  ;;  %s1868_s2 = sld [smem:[#allocation21_spill]]  ;;  %s241_s12 = int_to_ptr.vmem [resolvable:$true] %s1531_s12 }
  0x19   : > { %p1525_p11 = pnand %p1093_p9, %p1857_p1 }
  0x1b   : > { %p1541_p13 = pneg %p1525_p11 }
  0x1e   : > { %s1171_s15 = scalar_lea.hbm %s1868_s2, 512 }
  0x1f   : > { %p1172_p12 = scmp.ne.s32.totalorder %s1868_s2, %s1171_s15  ;;  %p1178_p5 = scmp.lt.u32.totalorder %s1171_s15, %s1868_s2 }
  0x21   : > { %p1174_p0 = pnand %p1541_p13, %p1172_p12 }
  0x23   : > { %p1175_p3 = pneg %p1174_p0 }
  0x25   : > { %p1180_p7 = pnand %p1178_p5, %p1175_p3 }
  0x27   : > { %1183 = shalt.err (!%p1180_p7)
}
  0x28   : > { %s1184_s26 = scalar_lea.vmem %s1518_s7, 512  ;;  %p1192_p2 = scmp.lt.s32.totalorder %s1518_s7, %s1518_s7 }
  0x29   : > { %p1185_p9 = scmp.ne.s32.totalorder %s1518_s7, %s1184_s26  ;;  %p1193_p6 = scmp.lt.s32.totalorder %s1184_s26, %s1184_s26 }
  0x2b   : > { %p1187_p10 = pnand %p1185_p9, %p1541_p13  ;;  %p1194_p12 = por %p1193_p6, %p1192_p2 }
  0x2d   : > { %p1188_p1 = pneg %p1187_p10 }
  0x2f   : > { %p1195_p0 = pnand %p1194_p12, %p1188_p1 }
  0x31   : > { %1198 = shalt.err (!%p1195_p0)
}
  0x32   : > { %s1860_s30 = smov 128   ;;  %s1861_s9 = smov 8  }
  0x33   : > { %1096 = dma.hbm_to_vmem [thread:$0]  (!%p1525_p11), %s1868_s2, 512, %s1518_s7, [#allocation6], %s1860_s30, %s1860_s30, %s1861_s9  }
  0x34   : > { %s1199_s16 = scalar_lea.hbm %s1853_s3, 512 }
  0x35   : > { %p1200_p1 = scmp.ne.s32.totalorder %s1853_s3, %s1199_s16  ;;  %p1206_p10 = scmp.lt.u32.totalorder %s1199_s16, %s1853_s3 }
  0x37   : > { %p1202_p2 = pnand %p1200_p1, %p1541_p13 }
  0x39   : > { %p1203_p6 = pneg %p1202_p2 }
  0x3b   : > { %p1208_p3 = pnand %p1206_p10, %p1203_p6 }
  0x3d   : > { %1211 = shalt.err (!%p1208_p3)
}
  0x3e   : > { %s1212_s7 = scalar_lea.vmem %s1529_s10, 512  ;;  %p1220_p12 = scmp.lt.s32.totalorder %s1529_s10, %s1529_s10 }
  0x3f   : > { %p1213_p5 = scmp.ne.s32.totalorder %s1529_s10, %s1212_s7  ;;  %p1221_p0 = scmp.lt.s32.totalorder %s1212_s7, %s1212_s7 }
  0x41   : > { %p1215_p7 = pnand %p1213_p5, %p1541_p13  ;;  %p1222_p1 = por %p1221_p0, %p1220_p12 }
  0x43   : > { %p1216_p9 = pneg %p1215_p7 }
  0x45   : > { %p1223_p2 = pnand %p1222_p1, %p1216_p9 }
  0x47   : > { %1226 = shalt.err (!%p1223_p2)
}
  0x48   : > { %1099 = dma.hbm_to_vmem [thread:$0]  (!%p1525_p11), %s1853_s3, 512, %s1529_s10, [#allocation9], %s1860_s30, %s1860_s30, %s1861_s9  }
  0x49   : > { %s1227_s16 = scalar_lea.hbm %s1854_s4, 512 }
  0x4a   : > { %p1228_p6 = scmp.ne.s32.totalorder %s1854_s4, %s1227_s16  ;;  %p1234_p5 = scmp.lt.u32.totalorder %s1227_s16, %s1854_s4 }
  0x4c   : > { %p1230_p10 = pnand %p1228_p6, %p1541_p13 }
  0x4e   : > { %p1231_p3 = pneg %p1230_p10 }
  0x50   : > { %p1236_p7 = pnand %p1234_p5, %p1231_p3 }
  0x52   : > { %1239 = shalt.err (!%p1236_p7)
}
  0x53   : > { %s1240_s7 = scalar_lea.vmem %s241_s12, 512  ;;  %p1248_p1 = scmp.lt.s32.totalorder %s241_s12, %s241_s12 }
  0x54   : > { %p1241_p9 = scmp.ne.s32.totalorder %s241_s12, %s1240_s7  ;;  %p1249_p2 = scmp.lt.s32.totalorder %s1240_s7, %s1240_s7 }
  0x56   : > { %p1243_p12 = pnand %p1241_p9, %p1541_p13  ;;  %p1250_p4 = por %p1249_p2, %p1248_p1 }
  0x58   : > { %p1244_p0 = pneg %p1243_p12 }
  0x5a   : > { %p1251_p8 = pnand %p1250_p4, %p1244_p0 }
  0x5c   : > { %1254 = shalt.err (!%p1251_p8)
}
  0x5d   : > { %1102 = dma.hbm_to_vmem [thread:$0]  (!%p1525_p11), %s1854_s4, 512, %s241_s12, [#allocation9], %s1860_s30, %s1860_s30, %s1861_s9  }
  0x5e   : > { %s1614_s18 = sadd.s32 1, %s1425_s24   ;;  %s37_s13 = sadd.s32 1, %s1421_s23 }
  0x5f   : > { %s34_s8 = ssub.s32 %s1425_s24, %s1614_s18  ;;  %p44_p8 = scmp.ne.s32.totalorder %s1421_s23, %s1417_s22 }
  0x60   : > { %p35_p4 = scmp.eq.s32.totalorder %s34_s8, 0  ;;  %p45_p13 = scmp.eq.s32.totalorder %s1425_s24, 0 }
  0x61   : > { %p1120_p6 = scmp.lt.s32.totalorder %s1425_s24, 2  ;;  %p1870_p3 = scmp.eq.s32.totalorder %s1495_s25, 1 }
  0x62   : > { %s1624_s14 = scalar_select %p35_p4, %s1421_s23, %s37_s13  }
  0x63   : > { %p46_p10 = por %p45_p13, %p44_p8  ;;  %p1628_p5 = por %p1870_p3, %p44_p8 }
  0x64   : > { %s1633_s16 = sand.u32 1, %s1421_s23   ;;  %s952_s12 = sshll.u32 %s1425_s24, 7 }
  0x65   : > { %s951_s17 = sshll.u32 %s1633_s16, 3  ;;  %s1872_s0 = sld [smem:[#allocation20_spill]] }
  0x66   : > { %s258_s7 = scalar_lea.vmem [#allocation2], %s951_s17  ;;  %p1642_p11 = pnand %p1120_p6, %p46_p10 }
  0x67   : > { %s265_s10 = sshll.u32 %s258_s7, 4  ;;  %s953_s8 = sshll.u32 %s1633_s16, 4  ;;  %s1646_s10 = int_to_ptr.vmem [resolvable:$true] %s265_s10 }
  0x68   : > { %s255_s13 = scalar_lea.sflag [#allocation3], %s1633_s16  ;;  %p1257_p9 = pneg %p1642_p11 }
  0x6b   : > { %s1640_s26 = scalar_lea.hbm %s1872_s0, %s952_s12  ;;  %s1260_s19 = scalar_lea.hbm %s1872_s0, 256 }
  0x6c   : > { %s1255_s30 = scalar_lea.hbm %s1640_s26, 128  ;;  %p1261_p1 = scmp.lt.u32.totalorder %s1640_s26, %s1872_s0 }
  0x6d   : > { %p1256_p7 = scmp.ne.s32.totalorder %s1640_s26, %s1255_s30  ;;  %p1262_p2 = scmp.lt.u32.totalorder %s1260_s19, %s1255_s30 }
  0x6e   : > { %p1264_p8 = scmp.lt.u32.totalorder %s1255_s30, %s1640_s26 }
  0x6f   : > { %p1258_p12 = pnand %p1257_p9, %p1256_p7  ;;  %p1263_p4 = por %p1262_p2, %p1261_p1 }
  0x71   : > { %p1259_p0 = pneg %p1258_p12  ;;  %p1265_p13 = por %p1264_p8, %p1263_p4 }
  0x73   : > { %p1266_p6 = pnand %p1265_p13, %p1259_p0 }
  0x75   : > { %1269 = shalt.err (!%p1266_p6)
}
  0x76   : > { %s1270_s9 = scalar_lea.vmem %s1646_s10, 128  ;;  %s1432_s12 = smov [#allocation2]  }
  0x77   : > { %p1271_p10 = scmp.ne.s32.totalorder %s1646_s10, %s1270_s9  ;;  %s1275_s17 = sshll.u32 %s1432_s12, 4  ;;  %s1276_s17 = int_to_ptr.vmem [resolvable:$false] %s1275_s17 }
  0x78   : > { %s1277_s20 = scalar_lea.vmem %s1276_s17, 256  ;;  %p1278_p12 = scmp.lt.s32.totalorder %s1646_s10, %s1276_s17 }
  0x79   : > { %p1273_p3 = pnand %p1271_p10, %p1257_p9  ;;  %p1279_p1 = scmp.lt.s32.totalorder %s1277_s20, %s1270_s9 }
  0x7b   : > { %p1274_p7 = pneg %p1273_p3  ;;  %p1280_p2 = por %p1279_p1, %p1278_p12 }
  0x7d   : > { %p1281_p4 = pnand %p1280_p2, %p1274_p7 }
  0x7f   : > { %1284 = shalt.err (!%p1281_p4)
}
  0x80   : > { %1106 = dma.hbm_to_vmem [thread:$0]  (!%p1642_p11), %s1640_s26, 128, %s1646_s10, %s255_s13  }
  0x81   : > { %s276_s30 = scalar_lea.vmem [#allocation5], %s953_s8  ;;  %s272_s7 = sand.u32 1, %s1425_s24  }
  0x82   : > { %s283_s19 = sshll.u32 %s276_s30, 4  ;;  %s977_s12 = sshll.u32 %s1425_s24, 8  ;;  %s1678_s19 = int_to_ptr.vmem [resolvable:$true] %s283_s19 }
  0x83   : > { %s1684_s20 = scalar_lea.hbm %s1851_s1, %s977_s12  ;;  %s1686_s0 = scalar_lea.sflag [#allocation6], %s272_s7 }
  0x84   : > { %s1285_s2 = scalar_lea.hbm %s1684_s20, 256  ;;  %s1290_s10 = scalar_lea.hbm %s1851_s1, 512 }
  0x85   : > { %p1286_p0 = scmp.ne.s32.totalorder %s1684_s20, %s1285_s2  ;;  %p1291_p6 = scmp.lt.u32.totalorder %s1684_s20, %s1851_s1 }
  0x86   : > { %p1292_p10 = scmp.lt.u32.totalorder %s1290_s10, %s1285_s2  ;;  %p1294_p7 = scmp.lt.u32.totalorder %s1285_s2, %s1684_s20 }
  0x87   : > { %p1288_p8 = pnand %p1286_p0, %p1257_p9 }
  0x88   : > { %p1293_p3 = por %p1292_p10, %p1291_p6 }
  0x89   : > { %p1289_p13 = pneg %p1288_p8 }
  0x8a   : > { %p1295_p12 = por %p1294_p7, %p1293_p3 }
  0x8c   : > { %p1296_p1 = pnand %p1295_p12, %p1289_p13 }
  0x8e   : > { %1299 = shalt.err (!%p1296_p1)
}
  0x8f   : > { %s1300_s30 = scalar_lea.vmem %s1678_s19, 256  ;;  %s1433_s7 = smov [#allocation5]  }
  0x90   : > { %p1301_p2 = scmp.ne.s32.totalorder %s1678_s19, %s1300_s30  ;;  %s1305_s12 = sshll.u32 %s1433_s7, 4  ;;  %s1306_s12 = int_to_ptr.vmem [resolvable:$false] %s1305_s12 }
  0x91   : > { %s1307_s9 = scalar_lea.vmem %s1306_s12, 512  ;;  %p1308_p8 = scmp.lt.s32.totalorder %s1678_s19, %s1306_s12 }
  0x92   : > { %p1303_p4 = pnand %p1301_p2, %p1257_p9  ;;  %p1309_p6 = scmp.lt.s32.totalorder %s1307_s9, %s1300_s30 }
  0x94   : > { %p1304_p0 = pneg %p1303_p4  ;;  %p1310_p10 = por %p1309_p6, %p1308_p8 }
  0x96   : > { %p1311_p3 = pnand %p1310_p10, %p1304_p0 }
  0x98   : > { %1314 = shalt.err (!%p1311_p3)
}
  0x99   : > { %s1874_s2 = smov 8   ;;  %s1875_s17 = smov 128  }
  0x9a   : > { %1109 = dma.hbm_to_vmem [thread:$0]  (!%p1642_p11), %s1684_s20, 256, %s1678_s19, %s1686_s0, %s1875_s17, %s1875_s17, %s1874_s2  }
  0x9b   : > { %p1876_p9 = scmp.ne.s32.totalorder %s1866_s29, 0 }
  0x9c   : > { %s1718_s16 = sand.u32 (!%p1876_p9), 1, %s1417_s22   ;;  %p1877_p13 = scmp.ne.s32.totalorder (!%p1876_p9), %s1864_s27, 0 }
  0x9d   : > { %295 = sbr.rel (%p1876_p9) target bundleno = 1373 (0x55d), region = 40  ;;  %s1721_s26 = sshll.u32 (!%p1876_p9), %s1718_s16, 3 }
  0x9e   : > { %s298_s11 = scalar_lea.sflag (!%p1876_p9), [#allocation3], %s1718_s16  ;;  %s301_s10 = scalar_lea.vmem (!%p1876_p9), [#allocation2], %s1721_s26 }
  0xa4   : > { %1388 = dma.done.wait (%p1877_p13), %s298_s11, 128  }
  0xa5   : > { %1390 = vsyncadd (%p1877_p13), %s298_s11, 4294967168  ;;  %s306_s0 = sand.u32 1, %s1495_s25   ;;  %s958_s29 = sshll.u32 %s1718_s16, 4 }
  0xa6   : > { %s307_s19 = scalar_lea.sflag [#allocation6], %s306_s0  ;;  %s1731_s20 = scalar_lea.vmem [#allocation5], %s958_s29 }
  0xa7   : > { %1392 = dma.done.wait (%p1877_p13), %s307_s19, 256  }
  0xa8   : > { %1394 = vsyncadd (%p1877_p13), %s307_s19, 4294967040  ;;  %p1878_p11 = scmp.eq.s32.totalorder %s1495_s25, 0 }
  0xaa   : > { %1396 = dma.done.wait (%p1878_p11), [#allocation6], 512   ;;  %p1879_p7 = pmov %p1878_p11 }
  0xac   : > { %1398 = vsyncadd (%p1879_p7), [#allocation6], 4294966784  ;;  %p1880_p12 = pmov %p1879_p7 }
  0xad   : > { %p1881_p1 = pmov %p1879_p7 }
  0xae   : > { %1400 = dma.done.wait (%p1880_p12), [#allocation9], 1024  }
  0xaf   : > { %1402 = vsyncadd (%p1881_p1), [#allocation9], 4294966272  ;;  %v1434_v0 = vmov 0.0|0.0   ;;  %vm1435_vm0 = vmmov 0   ;;  %v1436_v1 = vmov 0.0   ;;  %v364_v2 = vld [vmem:[#allocation7] sm:$0xff] }
  0xb0   : > { %1046 = vmatprep.subr.bf16.mxu0 %v1434_v0  ;;  %1007 = vmatprep.mubr.msk.f32.mxu0 %vm1435_vm0, %v1436_v1  ;;  %v365_v3 = vld [vmem:[#allocation7 + $0x8] sm:$0xff]  ;;  %v366_v4 = vld [vmem:[#allocation7 + $0x10] sm:$0xff]  ;;  %v367_v6 = vld [vmem:[#allocation7 + $0x18] sm:$0xff]  ;;  %vm368_vm1 = vcmask 261120   ;;  %vm529_vm3 = vcmask 130048   ;;  %s360_s27 = scalar_lea.vmem [#allocation12], %s1721_s26 }
  0xb1   : > { %1059 = vmatprep.subr.bf16.mxu1 %v1434_v0  ;;  %1032 = vmatprep.mubr.msk.f32.mxu1 %vm1435_vm0, %v1436_v1  ;;  %v1047_v5 = vpack.c.bf16 %v365_v3, %v364_v2  ;;  %v446_v7 = vld [vmem:[#allocation10] sm:$0xff]  ;;  %v447_v8 = vld [vmem:[#allocation10 + $0x8] sm:$0xff]  ;;  %v1050_v9 = vpack.c.bf16 %v367_v6, %v366_v4  ;;  %v448_v11 = vld [vmem:[#allocation10 + $0x10] sm:$0xff]  ;;  %s973_s8 = sshll.u32 %s1495_s25, 7  ;;  %s792_s12 = sshll.u32 %s360_s27, 4  ;;  %s793_s12 = int_to_ptr.vmem [resolvable:$true] %s792_s12 }
  0xb2   : > { %v1060_v10 = vpack.c.bf16 %v447_v8, %v446_v7  ;;  %v449_v12 = vld [vmem:[#allocation10 + $0x18] sm:$0xff]  ;;  %v362_v15 = vld [vmem:[%s1731_s20] sm:$0xff]  ;;  %vm1054_vm2 = vmpackc.low %vm368_vm1, %vm368_vm1  ;;  %s1779_s7 = scalar_lea.hbm %s1856_s6, %s973_s8  ;;  %s766_s9 = scalar_lea.sflag [#allocation13], %s1718_s16 }
  0xb3   : > { %1048 = vmatpush3.bf16.msra.mxu0 %v1047_v5  ;;  %v1063_v13 = vpack.c.bf16 %v449_v12, %v448_v11  ;;  %v361_v14 = vld [vmem:[%s301_s10] sm:$0xff]  ;;  %v442_v28 = vld [vmem:[#allocation8] sm:$0xff]  ;;  %v443_v29 = vld [vmem:[#allocation8 + $0x8] sm:$0xff]  ;;  %s1315_s2 = scalar_lea.vmem %s793_s12, 128  ;;  %s1437_s17 = smov [#allocation12]  }
  0xb4   : > { %1049 = vmatprep.subr.bf16.mxu0 %v1434_v0  ;;  %1061 = vmatpush3.bf16.msra.mxu1 %v1060_v10  ;;  %v363_v16 = vld [vmem:[%s1731_s20 + $0x8] sm:$0xff]  ;;  %v444_v30 = vld [vmem:[#allocation8 + $0x10] sm:$0xff]  ;;  %v1066_v31 = vpack.c.bf16 %v443_v29, %v442_v28  ;;  %p1316_p2 = scmp.ne.s32.totalorder %s793_s12, %s1315_s2  ;;  %s1319_s11 = sshll.u32 %s1437_s17, 4  ;;  %s1320_s11 = int_to_ptr.vmem [resolvable:$false] %s1319_s11 }
  0xb5   : > { %1062 = vmatprep.subr.bf16.mxu1 %v1434_v0  ;;  %v1053_v17 = vpack.c.bf16 %v363_v16, %v362_v15  ;;  %v445_v32 = vld [vmem:[#allocation8 + $0x18] sm:$0xff]  ;;  %s1321_s10 = scalar_lea.vmem %s1320_s11, 256  ;;  %p1322_p8 = scmp.lt.s32.totalorder %s793_s12, %s1320_s11 }
  0xb6   : > { %v1069_v33 = vpack.c.bf16 %v445_v32, %v444_v30  ;;  %p1317_p4 = pnand %p1316_p2, %p1628_p5  ;;  %p1323_p6 = scmp.lt.s32.totalorder %s1321_s10, %s1315_s2 }
  0xb7   : > { %1051 = vmatpush3.bf16.msra.mxu0 %v1050_v9 }
  0xb8   : > { %1052 = vmatprep.subr.bf16.mxu0 %v1434_v0  ;;  %1064 = vmatpush3.bf16.msra.mxu1 %v1063_v13  ;;  %p1318_p0 = pneg %p1317_p4  ;;  %p1324_p10 = por %p1323_p6, %p1322_p8 }
  0xb9   : > { %1065 = vmatprep.subr.bf16.mxu1 %v1434_v0 }
  0xba   : > { %1008 = vmatmul.mubr.msk.f32.vlgmr.msra.gmra.mrb[0].mxu0 %vm368_vm1, %v361_v14  ;;  %p1325_p3 = pnand %p1324_p10, %p1318_p0 }
  0xbb   : > { %1014 = vmatprep.mubr.msk.f32.mxu0 %vm1435_vm0, %v1436_v1 }
  0xc0   : > { %1055 = vmatpush3.bf16.xpose.msk.msra.mxu0 %vm1054_vm2, %v1053_v17 }
  0xc1   : > { %1056 = vmatprep.subr.bf16.mxu0 %v1434_v0 }
 0x18d   : > { %v438_v18 = vpop.f32.mrb[0].mxu0 }
 0x18e   : > { %v1009_v19 = vpop.f32.mrb[1].mxu0  ;;  %1015 = vmatmul.mubr.msk.f32.vlgmr.msra.gmra.mrb[2].mxu0 %vm368_vm1, %v438_v18  ;;  %1033 = vmatmul.mubr.msk.f32.vlgmr.msra.gmra.mrb[0].mxu1 %vm368_vm1, %v438_v18 }
 0x18f   : > { %1058 = vmatpush3.bf16.msra.mxu0 %v1053_v17  ;;  %1021 = vmatprep.mubr.msk.f32.mxu0 %vm1435_vm0, %v1436_v1 }
 0x190   : > { %1043 = vmatprep.mubr.msk.f32.mxu1 %vm1435_vm0, %v1436_v1  ;;  %1067 = vmatpush3.bf16.msra.mxu1 %v1066_v31 }
 0x191   : > { %1068 = vmatprep.subr.bf16.mxu1 %v1434_v0 }
 0x194   : > { %1070 = vmatpush3.bf16.msra.mxu1 %v1069_v33 }
 0x261   : > { %v525_v20 = vpop.f32.mrb[2].mxu0 }
 0x262   : > { %v1016_v21 = vpop.f32.mrb[3].mxu0  ;;  %v530_v22 = vsel %vm529_vm3, %v525_v20, -inf }
 0x263   : > { %531 = vmax.xlane.f32.xlu0 %v530_v22 }
 0x2f0   : > { %v532_v23 = vpop.xlane.xlu0 %531 }
 0x2f1   : > { %v533_v24 = vsub.f32 %v525_v20, %v532_v23 }
 0x2f3   : > { %v534_v25 = vmul.f32 1.442695, %v533_v24 }
 0x2f5   : > { %1165 = vpow2.f32 %v534_v25 }
 0x2ff   : > { %v1166_v26 = vpop.eup %1165 }
 0x300   : > { %v536_v27 = vsel %vm529_vm3, %v1166_v26, 0.0 }
 0x301   : > { %537 = vadd.xlane.f32.xlu0 %v536_v27 }
 0x38e   : > { %v538_v34 = vpop.xlane.xlu0 %537 }
 0x38f   : > { %1167 = vrcp.f32 %v538_v34 }
 0x399   : > { %v1168_v35 = vpop.eup %1167 }
 0x39a   : > { %v540_v36 = vmul.f32 %v1168_v35, %v1166_v26 }
 0x39c   : > { %1022 = vmatmul.mubr.msk.f32.vlgmr.msra.gmra.mrb[4].mxu0 %vm529_vm3, %v540_v36  ;;  %759 = vst.msk [vmem:[%s360_s27] sm:$0xff] %vm529_vm3, %v540_v36 }
 0x46f   : > { %v610_v37 = vpop.f32.mrb[4].mxu0 }
 0x470   : > { %v1023_v38 = vpop.f32.mrb[5].mxu0  ;;  %1044 = vmatmul.mubr.msk.f32.vlgmr.msra.gmra.mrb[0].mxu1 %vm368_vm1, %v610_v37 }
 0x471   : > { %1328 = shalt.err (!%p1325_p3)
}
 0x472   : > { %s1329_s0 = scalar_lea.hbm %s1779_s7, 128  ;;  %s1333_s20 = scalar_lea.hbm %s1856_s6, 256 }
 0x473   : > { %p1330_p9 = scmp.ne.s32.totalorder %s1779_s7, %s1329_s0  ;;  %p1334_p7 = scmp.lt.u32.totalorder %s1779_s7, %s1856_s6 }
 0x474   : > { %p1335_p12 = scmp.lt.u32.totalorder %s1333_s20, %s1329_s0  ;;  %p1337_p2 = scmp.lt.u32.totalorder %s1329_s0, %s1779_s7 }
 0x475   : > { %p1331_p13 = pnand %p1330_p9, %p1628_p5 }
 0x476   : > { %p1336_p1 = por %p1335_p12, %p1334_p7 }
 0x477   : > { %p1332_p11 = pneg %p1331_p13 }
 0x478   : > { %p1338_p4 = por %p1337_p2, %p1336_p1 }
 0x47a   : > { %p1339_p0 = pnand %p1338_p4, %p1332_p11 }
 0x47c   : > { %1342 = shalt.err (!%p1339_p0)
}
 0x47d   : > { %1090 = dma.vmem_to_hbm [thread:$0]  (%p1628_p5), %s793_s12, 128, %s1779_s7, %s766_s9  }
 0x47e   : > { %s353_s30 = scalar_lea.vmem [#allocation11], %s1721_s26  ;;  %s1805_s10 = scalar_lea.hbm %s1855_s5, %s973_s8 }
 0x47f   : > { %s779_s2 = sshll.u32 %s353_s30, 4  ;;  %s761_s7 = scalar_lea.sflag [#allocation4], %s1718_s16  ;;  %s1807_s2 = int_to_ptr.vmem [resolvable:$true] %s779_s2 }
 0x480   : > { %s1343_s12 = scalar_lea.vmem %s1807_s2, 128  ;;  %s1438_s25 = smov [#allocation11]  }
 0x481   : > { %p1344_p8 = scmp.ne.s32.totalorder %s1807_s2, %s1343_s12  ;;  %s1347_s26 = sshll.u32 %s1438_s25, 4  ;;  %s1348_s26 = int_to_ptr.vmem [resolvable:$false] %s1347_s26 }
 0x482   : > { %s1349_s9 = scalar_lea.vmem %s1348_s26, 256  ;;  %p1350_p3 = scmp.lt.s32.totalorder %s1807_s2, %s1348_s26 }
 0x483   : > { %p1345_p6 = pnand %p1344_p8, %p1628_p5  ;;  %p1351_p9 = scmp.lt.s32.totalorder %s1349_s9, %s1343_s12 }
 0x485   : > { %p1346_p10 = pneg %p1345_p6  ;;  %p1352_p13 = por %p1351_p9, %p1350_p3 }
 0x487   : > { %p1353_p11 = pnand %p1352_p13, %p1346_p10 }
 0x543   : > { %v753_v39 = vpop.f32.mrb[0].mxu1 }
 0x544   : > { %1169 = vtanh.f32 %v753_v39  ;;  %v1045_v40 = vpop.f32.mrb[1].mxu1 }
 0x54e   : > { %v1170_v41 = vpop.eup %1169 }
 0x54f   : > { %758 = vst.msk [vmem:[%s353_s30] sm:$0xff] %vm368_vm1, %v1170_v41 }
 0x550   : > { %1356 = shalt.err (!%p1353_p11)
}
 0x551   : > { %s1357_s16 = scalar_lea.hbm %s1805_s10, 128  ;;  %s1361_s29 = scalar_lea.hbm %s1855_s5, 256 }
 0x552   : > { %p1358_p7 = scmp.ne.s32.totalorder %s1805_s10, %s1357_s16  ;;  %p1362_p2 = scmp.lt.u32.totalorder %s1805_s10, %s1855_s5 }
 0x553   : > { %p1363_p4 = scmp.lt.u32.totalorder %s1361_s29, %s1357_s16  ;;  %p1365_p8 = scmp.lt.u32.totalorder %s1357_s16, %s1805_s10 }
 0x554   : > { %p1359_p12 = pnand %p1358_p7, %p1628_p5 }
 0x555   : > { %p1364_p0 = por %p1363_p4, %p1362_p2 }
 0x556   : > { %p1360_p1 = pneg %p1359_p12 }
 0x557   : > { %p1366_p6 = por %p1365_p8, %p1364_p0 }
 0x559   : > { %p1367_p10 = pnand %p1366_p6, %p1360_p1 }
 0x55b   : > { %1370 = shalt.err (!%p1367_p10)
}
 0x55c   : > { %1089 = dma.vmem_to_hbm [thread:$0]  (%p1628_p5), %s1807_s2, 128, %s1805_s10, %s761_s7  }
 0x55d PF: > { %s804_s27 = sand.u32 1, %s1413_s21   ;;  %p1882_p3 = scmp.ne.s32.totalorder %s1865_s28, 0 }
 0x55e   : > { %p1883_p9 = scmp.ge.s32.totalorder %s1425_s24, 2  ;;  %s805_s13 = scalar_lea.sflag [#allocation4], %s804_s27 }
 0x560   : > { %p1111_p13 = pnand %p1883_p9, %p1882_p3 }
 0x562   : > { %1404 = dma.done.wait (!%p1111_p13), %s805_s13, 128  }
 0x563   : > { %1406 = vsyncadd (!%p1111_p13), %s805_s13, 4294967168  ;;  %s814_s30 = scalar_lea.sflag [#allocation13], %s804_s27 }
 0x564   : > { %1408 = dma.done.wait (!%p1111_p13), %s814_s30, 128  }
 0x565   : > { %1410 = vsyncadd (!%p1111_p13), %s814_s30, 4294967168  ;;  %p27_p5 = scmp.ge.s32.totalorder %s1614_s18, 4   ;;  %s1884_s21 = smov %s1417_s22 }
 0x566   : > { %s1885_s22 = smov %s1421_s23  ;;  %s1886_s23 = smov %s1624_s14 }
 0x567   : > { %s1887_s24 = smov %s1614_s18  ;;  %29 = sbr.rel (!%p27_p5) target bundleno = 13 (0xd), region = 127 }
 0x56e   :  { %819 = vsyncpa [#allocation3], 1 }
 0x56f   :  { %821 = vsyncpa [#allocation3 + $0x1], 1 }
 0x570   :  { %822 = vsyncpa [#allocation6], 1 }
 0x571   :  { %824 = vsyncpa [#allocation6 + $0x1], 1 }
 0x572   :  { %825 = vsyncpa [#allocation9], 1 }
 0x573   :  { %826 = vsyncpa [#allocation4], 1 }
 0x574   :  { %828 = vsyncpa [#allocation4 + $0x1], 1 }
 0x575   :  { %829 = vsyncpa [#allocation13], 1 }
 0x576   :  { %831 = vsyncpa [#allocation13 + $0x1], 1 }

</bundles_post_ra>
